<compile_context>
chip_gen: v5e
topology: v5e:2x2
jax: 0.10.0
libtpu: 0.0.40
codegen_flags: <defaults>
</compile_context>

<pallas_src>
import functools

import jax
import jax.numpy as jnp
import numpy as np
from jax.experimental import pallas as pl
from jax.experimental.pallas import tpu as pltpu

_LANE = 128
_SUBLANE = 8
_VMEM_LIMIT = 32 * 1024 * 1024  # scoped VMEM request sized for v7x; OK on v5e/v6e
# TODO(synk): on 128-MiB-VMEM parts (v5e/v6e) raise the limit / tile budget to
# ~64 MiB and deepen the patch stream with pipeline_mode=pl.Buffered(3).


def _round_up(x, m):
    return (x + m - 1) // m * m


def _cdiv(a, b):
    return -(-a // b)


# ---------------- Pallas kernels ----------------

def _matmul_bias_kernel(p_ref, w_ref, b_ref, o_ref, acc_ref):
    # One (tile_m, tile_k) x (tile_k, Npad) MXU step with f32 accumulation.
    # Weight tiles stream over the "arbitrary" K axis; the accumulator and the
    # output block stay VMEM-resident across it.
    k = pl.program_id(1)

    @pl.when(k == 0)
    def _():
        acc_ref[...] = jnp.zeros_like(acc_ref)

    acc_ref[...] += jnp.dot(p_ref[...], w_ref[...],
                            preferred_element_type=jnp.float32)

    @pl.when(k == pl.num_programs(1) - 1)
    def _():
        o_ref[...] = acc_ref[...] + b_ref[...]   # bias added once, in f32


def _squash_kernel(u_ref, o_ref):
    # squash(u) = |u| / (1 + |u|^2) * u, with the capsule dim on the SUBLANE
    # axis (axis 0) and routes filling the 128 lanes -> lane-dense loads and
    # unmasked lane-dense stores.  sqrt + approx reciprocal issue on the EUP.
    # NOTE: returns 0 at |u| = 0 (the literal PyTorch formula is NaN there).
    u = u_ref[...]
    sq = jnp.sum(u * u, axis=0, keepdims=True)
    scale = jnp.sqrt(sq) * pl.reciprocal(1.0 + sq, approx=True)
    o_ref[...] = u * scale


# ---------------- tiling helpers ----------------

def _pick_tile_m(M, tile_k, Npad, vmem_budget=24 * 1024 * 1024):
    """Largest M tile (multiple of 8, <=512) whose working set fits the budget.
    Streamed weight tiles + bias counted x2 (double-buffered); per-row cost =
    bf16 patch tile + f32 out tile (x2 buffers) + f32 accumulator scratch.
    Budget sized against v7x (64 MiB physical / 32 MiB scoped), the tightest
    of v5e/v6e/v7x, so one code path runs on all three."""
    resident = 2 * tile_k * Npad * 2 + 2 * Npad * 4
    per_row = 2 * (tile_k * 2) + 2 * (Npad * 4) + Npad * 4
    avail = max(vmem_budget - resident, _SUBLANE * per_row)
    tile = max(_SUBLANE, min(512, avail // per_row))
    tile = (tile // _SUBLANE) * _SUBLANE
    if M <= tile:
        # Split into >=2 blocks so the "parallel" M axis can shard across both
        # v7x TensorCores (a grid of (1, ...) leaves one TC idle).
        tile = max(_SUBLANE, _round_up(_cdiv(M, 2), _SUBLANE))
    return tile


def _squash_cols_plan(cols, max_tile=16384):
    """Pad the route axis to whole 128-lane tiles and pick a column tile so the
    squash grid has >=2 'parallel' blocks (both v7x TCs), each moving a
    multi-KB slab rather than a 64 KB sliver."""
    colsP = _round_up(cols, _LANE)
    nblk = max(1, _cdiv(colsP, max_tile))
    if colsP > _LANE:
        nblk = max(nblk, 2)
    tile = _round_up(_cdiv(colsP, nblk), _LANE)
    return nblk * tile, tile, nblk


# ---------------- pallas_call wrappers ----------------

def conv_all_capsules_pallas(patches_bf16, w_t_bf16, bias_f32, tile_m, tile_k):
    """(Mpad, Kpad)bf16 @ (Kpad, Npad)bf16 + (1, Npad)f32 -> (Mpad, Npad)f32,
    tiled over (M parallel, K arbitrary) with an f32 VMEM accumulator."""
    Mpad, Kpad = patches_bf16.shape
    _, Npad = w_t_bf16.shape
    grid = (Mpad // tile_m, Kpad // tile_k)
    return pl.pallas_call(
        _matmul_bias_kernel,
        out_shape=jax.ShapeDtypeStruct((Mpad, Npad), jnp.float32),
        grid=grid,
        in_specs=[
            pl.BlockSpec((tile_m, tile_k), lambda i, k: (i, k)),  # patch tiles
            pl.BlockSpec((tile_k, Npad), lambda i, k: (k, 0)),    # streamed weights
            pl.BlockSpec((1, Npad), lambda i, k: (0, 0)),         # tiny bias, resident
        ],
        out_specs=pl.BlockSpec((tile_m, Npad), lambda i, k: (i, 0)),
        scratch_shapes=[pltpu.VMEM((tile_m, Npad), jnp.float32)],
        compiler_params=pltpu.CompilerParams(
            dimension_semantics=("parallel", "arbitrary"),
            vmem_limit_bytes=_VMEM_LIMIT,
        ),
    )(patches_bf16, w_t_bf16, bias_f32)


def squash_pallas(u_t, tile_c):
    """Column-wise squash of a (D, colsP) array: reduce over axis 0 (sublanes),
    routes on lanes -> lane-dense loads/stores.  colsP % tile_c == 0."""
    D, colsP = u_t.shape
    return pl.pallas_call(
        _squash_kernel,
        out_shape=jax.ShapeDtypeStruct((D, colsP), jnp.float32),
        grid=(colsP // tile_c,),
        in_specs=[pl.BlockSpec((D, tile_c), lambda i: (0, i))],
        out_specs=pl.BlockSpec((D, tile_c), lambda i: (0, i)),
        compiler_params=pltpu.CompilerParams(
            dimension_semantics=("parallel",),
            vmem_limit_bytes=_VMEM_LIMIT,
        ),
    )(u_t)


def im2col(x, K, stride, k_pad):
    """x: (B, C, H, W) NCHW -> patches (B*Ho*Wo, k_pad), feature order
    (c, di, dj); contraction dim zero-padded to k_pad for lane-dense MXU loads."""
    B, C, H, W = x.shape
    Ho = (H - K) // stride + 1
    Wo = (W - K) // stride + 1
    cols = []
    for di in range(K):
        for dj in range(K):
            cols.append(
                x[:, :, di:di + stride * Ho:stride, dj:dj + stride * Wo:stride])
    p = jnp.stack(cols, axis=2)                            # (B, C, K*K, Ho, Wo)
    p = p.transpose(0, 3, 4, 1, 2).reshape(B * Ho * Wo, C * K * K)
    p = jnp.pad(p, ((0, 0), (0, k_pad - C * K * K)))
    return p, Ho, Wo
# TODO(synk): on v5e-class HBM replace this XLA im2col (K*K-fold read
# amplification) with an in-kernel shift-accumulate conv over the K*K taps
# reading x directly ("arbitrary" tap axis + f32 VMEM accumulator).


@functools.partial(jax.jit, static_argnames=("num_routes", "stride"))
def primary_caps_forward(x, weights, biases, *, num_routes, stride=2):
    """x: (B, Cin, H, W); weights: (num_caps, out_ch, Cin, K, K);
    biases: (num_caps, out_ch).  Returns (B, num_routes, D)."""
    num_caps, out_ch, Cin, K, _ = weights.shape
    B = x.shape[0]
    N = num_caps * out_ch
    Kd = Cin * K * K
    Npad = _round_up(N, _LANE)    # lane-dense MXU columns / unmasked output stores

    # Contraction tiling: pad Kd to a multiple of 128 and pick a tile_k that
    # exactly divides the padded depth (<=512 so weight tiles stream).
    grid_k = max(1, _cdiv(Kd, 512))
    tile_k = _round_up(_cdiv(Kd, grid_k), _LANE)
    Kpad = grid_k * tile_k

    # im2col in bf16: halves patch HBM traffic, MXU is native bf16.
    patches, Ho, Wo = im2col(x.astype(jnp.bfloat16), K, stride, Kpad)
    S = Ho * Wo
    M = B * S
    assert (N * S) % num_routes == 0
    D = (N * S) // num_routes

    tile_m = _pick_tile_m(M, tile_k, Npad)
    Mpad = _round_up(M, tile_m)
    patches = jnp.pad(patches, ((0, Mpad - M), (0, 0)))    # no partial M blocks

    # weights (N, Kd) -> (Kpad, Npad) bf16; bias -> (1, Npad) f32 (zero-padded).
    w_all_t = weights.reshape(N, Kd).T
    w_all_t = jnp.pad(w_all_t, ((0, Kpad - Kd), (0, Npad - N))).astype(jnp.bfloat16)
    b_all = jnp.pad(biases.reshape(1, N), ((0, 0), (0, Npad - N))).astype(jnp.float32)

    conv = conv_all_capsules_pallas(patches, w_all_t, b_all, tile_m, tile_k)

    # Back to PyTorch's stacked order (b, cap, out_ch, i, j) viewed as
    # (b, route, D), then TRANSPOSED so routes land on the lane axis for the
    # squash kernel (lane-dense loads/stores, sublane-axis norm).  XLA fuses
    # the slice/transpose/reshape glue into a single copy of the small conv
    # tensor.
    # TODO(synk): fold this reorder into the squash kernel's input index_map
    # (or emit the conv output in bf16) to drop this intermediate HBM pass;
    # matters most on v5e's bandwidth.
    u = conv[:M].reshape(B, S, Npad)[:, :, :N].transpose(0, 2, 1)   # (B, N, S)
    u2 = u.reshape(B * num_routes, D)        # == torch .view(B, num_routes, -1)
    cols = B * num_routes
    colsP, tile_c, _ = _squash_cols_plan(cols)
    u2t = jnp.pad(u2.T, ((0, 0), (0, colsP - cols)))                # (D, colsP)

    out_t = squash_pallas(u2t, tile_c)                              # (D, colsP)
    return out_t[:, :cols].T.reshape(B, num_routes, D)


# ---------------- main ----------------

if __name__ == "__main__":
    # Scaled-down CapsNet primary caps: 8 capsules, each Conv2d(Cin=4 -> 8,
    # k=3, stride=2, no padding); 13x13 input -> 6x6; num_routes = 8*6*6 = 288.
    B, Cin, H, W = 2, 4, 13, 13
    num_caps, out_ch, K, stride = 8, 8, 3, 2
    Ho = (H - K) // stride + 1
    Wo = (W - K) // stride + 1
    num_routes = out_ch * Ho * Wo            # mirrors the default 32*6*6

    key = jax.random.PRNGKey(0)
    k1, k2, k3 = jax.random.split(key, 3)
    x = jax.random.normal(k1, (B, Cin, H, W), jnp.float32)
    fan_in = Cin * K * K
    bound = 1.0 / float(np.sqrt(fan_in))
    weights = jax.random.uniform(k2, (num_caps, out_ch, Cin, K, K),
                                 jnp.float32, -bound, bound)
    biases = jax.random.uniform(k3, (num_caps, out_ch),
                                jnp.float32, -bound, bound)

    out = primary_caps_forward(x, weights, biases,
                               num_routes=num_routes, stride=stride)
    out = jax.block_until_ready(out)

    # Pure-JAX f32 reference (exact PyTorch forward semantics).
    def ref(x, weights, biases):
        us = []
        for c in range(num_caps):
            y = jax.lax.conv_general_dilated(
                x, weights[c], window_strides=(stride, stride), padding="VALID",
                dimension_numbers=("NCHW", "OIHW", "NCHW"))
            us.append(y + biases[c][None, :, None, None])
        u = jnp.stack(us, axis=1).reshape(B, num_routes, -1)
        sq = jnp.sum(u * u, axis=-1, keepdims=True)
        return sq * u / ((1.0 + sq) * jnp.sqrt(sq))

    expected = jax.block_until_ready(ref(x, weights, biases))
    assert out.shape == expected.shape
    # Tolerance covers bf16 MXU inputs + approx reciprocal vs f32 reference.
    np.testing.assert_allclose(np.asarray(out), np.asarray(expected),
                               rtol=2e-2, atol=2e-2)
    print("KERNEL_OK")
</pallas_src>

<mosaic_0001>
module attributes {stable_mosaic.version = 11 : i64} {
  func.func @_matmul_bias_kernel(%arg0: i32, %arg1: i32, %arg2: memref<40x128xbf16, #tpu.memory_space<vmem>>, %arg3: memref<128x128xbf16, #tpu.memory_space<vmem>>, %arg4: memref<1x128xf32, #tpu.memory_space<vmem>>, %arg5: memref<40x128xf32, #tpu.memory_space<vmem>>, %arg6: memref<40x128xf32, #tpu.memory_space<vmem>>) attributes {dimension_semantics = [#tpu.dimension_semantics<parallel>, #tpu.dimension_semantics<arbitrary>], iteration_bounds = array<i64: 2, 1>, scalar_prefetch = 0 : i64, scratch_operands = 1 : i64, tpu.core_type = #tpu.core_type<tc>, window_params = [{transform_indices = @transform_0, window_bounds = array<i64: 40, 128>}, {transform_indices = @transform_1, window_bounds = array<i64: 128, 128>}, {pipeline_mode = #tpu.pipeline_mode<synchronous>, transform_indices = @transform_2, window_bounds = array<i64: 1, 128>}, {transform_indices = @transform_3, window_bounds = array<i64: 40, 128>}]} {
    %c0_i32 = arith.constant 0 : i32
    %0 = arith.cmpi eq, %arg1, %c0_i32 : i32
    %1 = arith.extui %0 : i1 to i32
    %c0_i32_0 = arith.constant 0 : i32
    %2 = arith.cmpi ne, %1, %c0_i32_0 : i32
    scf.if %2 {
      %cst_10 = arith.constant 0.000000e+00 : f32
      %12 = vector.broadcast %cst_10 : f32 to vector<40x128xf32>
      %c0_11 = arith.constant 0 : index
      %c0_12 = arith.constant 0 : index
      %13 = vector.load %arg6[%c0_11, %c0_12] : memref<40x128xf32, #tpu.memory_space<vmem>>, vector<40x128xf32>
      tpu.vector_store %arg6[%c0_11, %c0_12], %12 {strides = array<i32>} : memref<40x128xf32, #tpu.memory_space<vmem>>, vector<40x128xf32>,
    } else {
    }
    %c0 = arith.constant 0 : index
    %c0_1 = arith.constant 0 : index
    %3 = vector.load %arg6[%c0, %c0_1] : memref<40x128xf32, #tpu.memory_space<vmem>>, vector<40x128xf32>
    %c0_2 = arith.constant 0 : index
    %c0_3 = arith.constant 0 : index
    %4 = vector.load %arg2[%c0_2, %c0_3] : memref<40x128xbf16, #tpu.memory_space<vmem>>, vector<40x128xbf16>
    %c0_4 = arith.constant 0 : index
    %c0_5 = arith.constant 0 : index
    %5 = vector.load %arg3[%c0_4, %c0_5] : memref<128x128xbf16, #tpu.memory_space<vmem>>, vector<128x128xbf16>
    %cst = arith.constant dense<0.000000e+00> : vector<40x128xf32>
    %6 = tpu.matmul %4, %5, %cst {dimension_numbers = #tpu.dot_dimension_numbers<[1], [0], [0], [1], [0, 0, 1, 1], [], []>} : vector<40x128xbf16>, vector<128x128xbf16>, vector<40x128xf32> -> vector<40x128xf32>
    %7 = arith.addf %3, %6 : vector<40x128xf32>
    %c0_6 = arith.constant 0 : index
    %c0_7 = arith.constant 0 : index
    %8 = vector.load %arg6[%c0_6, %c0_7] : memref<40x128xf32, #tpu.memory_space<vmem>>, vector<40x128xf32>
    tpu.vector_store %arg6[%c0_6, %c0_7], %7 {strides = array<i32>} : memref<40x128xf32, #tpu.memory_space<vmem>>, vector<40x128xf32>,
    %c0_i32_8 = arith.constant 0 : i32
    %9 = arith.cmpi eq, %arg1, %c0_i32_8 : i32
    %10 = arith.extui %9 : i1 to i32
    %c0_i32_9 = arith.constant 0 : i32
    %11 = arith.cmpi ne, %10, %c0_i32_9 : i32
    scf.if %11 {
      %c0_10 = arith.constant 0 : index
      %c0_11 = arith.constant 0 : index
      %12 = vector.load %arg6[%c0_10, %c0_11] : memref<40x128xf32, #tpu.memory_space<vmem>>, vector<40x128xf32>
      %c0_12 = arith.constant 0 : index
      %c0_13 = arith.constant 0 : index
      %13 = vector.load %arg4[%c0_12, %c0_13] : memref<1x128xf32, #tpu.memory_space<vmem>>, vector<1x128xf32>
      %14 = vector.broadcast %13 : vector<1x128xf32> to vector<40x128xf32>
      %15 = arith.addf %12, %14 : vector<40x128xf32>
      %c0_14 = arith.constant 0 : index
      %c0_15 = arith.constant 0 : index
      %16 = vector.load %arg5[%c0_14, %c0_15] : memref<40x128xf32, #tpu.memory_space<vmem>>, vector<40x128xf32>
      tpu.vector_store %arg5[%c0_14, %c0_15], %15 {strides = array<i32>} : memref<40x128xf32, #tpu.memory_space<vmem>>, vector<40x128xf32>,
    } else {
    }
    return
  }
  func.func @transform_0(%arg0: i32, %arg1: i32) -> (i32, i32) {
    %c0_i32 = arith.constant 0 : i32
    return %arg0, %arg1 : i32, i32
  }
  func.func @transform_1(%arg0: i32, %arg1: i32) -> (i32, i32) {
    %c0_i32 = arith.constant 0 : i32
    %c0_i32_0 = arith.constant 0 : i32
    return %arg1, %c0_i32 : i32, i32
  }
  func.func @transform_2(%arg0: i32, %arg1: i32) -> (i32, i32) {
    %c0_i32 = arith.constant 0 : i32
    %c0_i32_0 = arith.constant 0 : i32
    %c0_i32_1 = arith.constant 0 : i32
    return %c0_i32, %c0_i32_0 : i32, i32
  }
  func.func @transform_3(%arg0: i32, %arg1: i32) -> (i32, i32) {
    %c0_i32 = arith.constant 0 : i32
    %c0_i32_0 = arith.constant 0 : i32
    return %arg0, %c0_i32 : i32, i32
  }
}

module attributes {stable_mosaic.version = 11 : i64} {
  func.func @_squash_kernel(%arg0: i32, %arg1: memref<8x384xf32, #tpu.memory_space<vmem>>, %arg2: memref<8x384xf32, #tpu.memory_space<vmem>>) attributes {dimension_semantics = [#tpu.dimension_semantics<parallel>], iteration_bounds = array<i64: 2>, scalar_prefetch = 0 : i64, scratch_operands = 0 : i64, tpu.core_type = #tpu.core_type<tc>, window_params = [{transform_indices = @transform_0, window_bounds = array<i64: 8, 384>}, {transform_indices = @transform_1, window_bounds = array<i64: 8, 384>}]} {
    %c0 = arith.constant 0 : index
    %c0_0 = arith.constant 0 : index
    %0 = vector.load %arg1[%c0, %c0_0] : memref<8x384xf32, #tpu.memory_space<vmem>>, vector<8x384xf32>
    %1 = arith.mulf %0, %0 : vector<8x384xf32>
    %cst = arith.constant dense<0.000000e+00> : vector<384xf32>
    %2 = vector.multi_reduction <add>, %1, %cst [0] : vector<8x384xf32> to vector<384xf32>
    %3 = vector.shape_cast %2 : vector<384xf32> to vector<1x384xf32>
    %4 = math.sqrt %3 : vector<1x384xf32>
    %cst_1 = arith.constant 1.000000e+00 : f32
    %5 = vector.broadcast %cst_1 : f32 to vector<1x384xf32>
    %6 = arith.addf %5, %3 : vector<1x384xf32>
    %7 = tpu.reciprocal %6 {approx = true} : vector<1x384xf32> -> vector<1x384xf32>
    %8 = arith.mulf %4, %7 : vector<1x384xf32>
    %9 = vector.broadcast %8 : vector<1x384xf32> to vector<8x384xf32>
    %10 = arith.mulf %0, %9 : vector<8x384xf32>
    %c0_2 = arith.constant 0 : index
    %c0_3 = arith.constant 0 : index
    %11 = vector.load %arg2[%c0_2, %c0_3] : memref<8x384xf32, #tpu.memory_space<vmem>>, vector<8x384xf32>
    tpu.vector_store %arg2[%c0_2, %c0_3], %10 {strides = array<i32>} : memref<8x384xf32, #tpu.memory_space<vmem>>, vector<8x384xf32>,
    return
  }
  func.func @transform_0(%arg0: i32) -> (i32, i32) {
    %c0_i32 = arith.constant 0 : i32
    %c0_i32_0 = arith.constant 0 : i32
    return %c0_i32, %arg0 : i32, i32
  }
  func.func @transform_1(%arg0: i32) -> (i32, i32) {
    %c0_i32 = arith.constant 0 : i32
    %c0_i32_0 = arith.constant 0 : i32
    return %c0_i32, %arg0 : i32, i32
  }
}

</mosaic_0001>

<bundles_post_ra>
// kernel: primary_caps_forward.2
= control target key start
LH: loop header
LB: loop body
LE: loop exit
PB: predicated region body
PF: predicated region fallthrough
CT: control target
= control target key end

     0   :  { %s601_s12 = smov 0   ;;  %s603_s13 = smov 0   ;;  %s665_s0 = inlined_call_operand.vmem [shape: bf16[80,128], index: 0, kind: input, shape index: {}]   ;;  %s666_s1 = inlined_call_operand.vmem [shape: bf16[128,128], index: 1, kind: input, shape index: {}]   ;;  %s667_s2 = inlined_call_operand.vmem [shape: f32[1,128], index: 2, kind: input, shape index: {}]   ;;  %s668_s3 = inlined_call_operand.vmem [shape: f32[80,128], index: 3, kind: output, shape index: {}]  }
   0x1   :  { %s605_s14 = smov 0  }
   0x2 LB: > { %s25_s15 = sadd.s32 1, %s575_s13  ;;  %p461_p0 = scmp.ge.s32.totalorder %s579_s14, 1  ;;  %s579_s14 = sphi %s605_s14, %s13_s14   ;;  %s575_s13 = sphi %s603_s13, %s670_s13   ;;  %s571_s12 = sphi %s601_s12, %s669_s12  }
   0x3   : > { %p27_p1 = scmp.ge.s32.totalorder %s25_s15, 2  ;;  %p166_p2 = scmp.lt.s32.totalorder %s579_s14, 3 }
   0x5   : > { %s672_s15 = smov (%p27_p1, %s25_s15), 0  ;;  %p167_p3 = pnand %p461_p0, %p166_p2 }
   0x6   : > { %s198_s20 = smul.u32 (!%p167_p3), 5, %s571_s12 }
   0x7   : > { %170 = sbr.rel (%p167_p3) target bundleno = 185 (0xb9), region = 32 }
   0x8   : > { %p199_p4 = scmp.lt.s32.totalorder (!%p167_p3), %s198_s20, 9 }
   0xc   : > { %v515_v0 = vld [vmem:[%s666_s1 + $0x38] sm:$0xff]  ;;  %v514_v1 = vld [vmem:[%s666_s1 + $0x30] sm:$0xff]  ;;  %v513_v2 = vld [vmem:[%s666_s1 + $0x28] sm:$0xff]  ;;  %s674_s20 = smov (!%p199_p4, %s198_s20), 9 }
   0xd   : > { %318 = vmatpush.bf16.msra.mxu0 %v515_v0  ;;  %516 = vmatpush.bf16.msra.mxu1 %v515_v0  ;;  %v512_v3 = vld [vmem:[%s666_s1 + $0x20] sm:$0xff]  ;;  %v511_v4 = vld [vmem:[%s666_s1 + $0x18] sm:$0xff]  ;;  %s462_s27 = sshll.u32 %s674_s20, 2  ;;  %v510_v5 = vld [vmem:[%s666_s1 + $0x10] sm:$0xff]  ;;  %s463_s10 = sshll.u32 %s674_s20, 3 }
   0xe   : > { %517 = vmatpush.bf16.msra.mxu2 %v515_v0  ;;  %s205_s5 = scalar_lea.vmem %s665_s0, %s462_s27  ;;  %v509_v6 = vld [vmem:[%s666_s1 + $0x8] sm:$0xff]  ;;  %v508_v8 = vld [vmem:[%s666_s1] sm:$0xff]  ;;  %s217_s18 = scalar_lea.vmem %s668_s3, %s463_s10 }
   0xf   : > { %v237_v7 = vld [vmem:[%s205_s5 + $0x10] sm:$0xf]  ;;  %v506_v10 = vld [vmem:[%s205_s5] sm:$0xff]  ;;  %v507_v11 = vld [vmem:[%s205_s5 + $0x8] sm:$0xff] }
  0x10   : > { %v263_v9 = vunpack.c.l.b16 %v237_v7  ;;  %v556_v13 = vld [vmem:[%s667_s2] ss:$0 sm:$0xff] }
  0x11   : > { %319 = vmatpush.bf16.msra.mxu0 %v514_v1  ;;  %518 = vmatpush.bf16.msra.mxu1 %v514_v1 }
  0x12   : > { %519 = vmatpush.bf16.msra.mxu2 %v514_v1  ;;  %v266_v12 = vpack.c.b16 %v263_v9, %v263_v9 }
  0x15   : > { %320 = vmatpush.bf16.msra.mxu0 %v513_v2  ;;  %520 = vmatpush.bf16.msra.mxu1 %v513_v2 }
  0x16   : > { %521 = vmatpush.bf16.msra.mxu2 %v513_v2 }
  0x19   : > { %321 = vmatpush.bf16.msra.mxu0 %v512_v3  ;;  %522 = vmatpush.bf16.msra.mxu1 %v512_v3 }
  0x1a   : > { %523 = vmatpush.bf16.msra.mxu2 %v512_v3 }
  0x1d   : > { %322 = vmatpush.bf16.msra.mxu0 %v511_v4  ;;  %524 = vmatpush.bf16.msra.mxu1 %v511_v4 }
  0x1e   : > { %525 = vmatpush.bf16.msra.mxu2 %v511_v4 }
  0x21   : > { %323 = vmatpush.bf16.msra.mxu0 %v510_v5  ;;  %526 = vmatpush.bf16.msra.mxu1 %v510_v5 }
  0x22   : > { %527 = vmatpush.bf16.msra.mxu2 %v510_v5 }
  0x25   : > { %324 = vmatpush.bf16.msra.mxu0 %v509_v6  ;;  %528 = vmatpush.bf16.msra.mxu1 %v509_v6 }
  0x26   : > { %529 = vmatpush.bf16.msra.mxu2 %v509_v6 }
  0x29   : > { %325 = vmatpush.bf16.msra.mxu0 %v508_v8  ;;  %530 = vmatpush.bf16.msra.mxu1 %v508_v8 }
  0x2a   : > { %531 = vmatpush.bf16.msra.mxu2 %v508_v8 }
  0x2c   : > { %326 = vmatmul.bf16.vlgmr.msra.gmra.mxu0 %v506_v10  ;;  %331 = vmatmul.bf16.vlgmr.msra.gmra.mxu1 %v507_v11 }
  0x2d   : > { %336 = vmatmul.bf16.vlgmr.msra.gmra.mxu2 %v266_v12 }
  0xa9   : > { %v327_v14 = vpop.f32.mrf.mxu0  ;;  %v332_v15 = vpop.f32.mrf.mxu1 }
  0xaa   : > { %v363_v16 = vadd.f32 %v556_v13, %v327_v14  ;;  %v365_v17 = vadd.f32 %v556_v13, %v332_v15 }
  0xac   : > { %368 = vst [vmem:[%s217_s18] sm:$0xff] %v363_v16 }
  0xad   : > { %370 = vst [vmem:[%s217_s18 + $0x10] sm:$0xff] %v365_v17 }
  0xb0   : > { %v337_v18 = vpop.f32.mrf.mxu2 }
  0xb1   : > { %v367_v19 = vadd.f32 %v556_v13, %v337_v18  ;;  %v329_v20 = vpop.f32.mrf.mxu0  ;;  %v334_v21 = vpop.f32.mrf.mxu1 }
  0xb2   : > { %v364_v22 = vadd.f32 %v556_v13, %v329_v20  ;;  %v366_v23 = vadd.f32 %v556_v13, %v334_v21 }
  0xb3   : > { %372 = vst [vmem:[%s217_s18 + $0x20] sm:$0xff] %v367_v19 }
  0xb4   : > { %369 = vst [vmem:[%s217_s18 + $0x8] sm:$0xff] %v364_v22 }
  0xb5   : > { %371 = vst [vmem:[%s217_s18 + $0x18] sm:$0xff] %v366_v23 }
  0xb8   : > { %v339_v24 = vpop.f32.mrf.mxu2 }
  0xb9 PF: > { %s13_s14 = sadd.s32 1, %s579_s14   ;;  %s669_s12 = smov %s575_s13 }
  0xba   : > { %p10_p5 = scmp.ge.s32.totalorder %s13_s14, 4   ;;  %s670_s13 = smov %s672_s15 }
  0xbc   :  { %12 = sbr.rel (!%p10_p5) target bundleno = 2 (0x2), region = 73 }

// kernel: primary_caps_forward.3
= control target key start
LH: loop header
LB: loop body
LE: loop exit
PB: predicated region body
PF: predicated region fallthrough
CT: control target
= control target key end

     0   :  { %s298_s6 = smov 0   ;;  %s338_s0 = inlined_call_operand.vmem [shape: f32[8,768], index: 0, kind: input, shape index: {}]   ;;  %s339_s1 = inlined_call_operand.vmem [shape: f32[8,768], index: 1, kind: output, shape index: {}]  }
   0x1 LB: > { %s251_s7 = sadd.s32 4294967295, %s286_s6   ;;  %p255_p0 = scmp.ge.s32.totalorder %s286_s6, 1  ;;  %s286_s6 = sphi %s298_s6, %s11_s6  }
   0x2   : > { %p88_p1 = scmp.lt.s32.totalorder %s286_s6, 3 }
   0x4   : > { %p89_p2 = pnand %p255_p0, %p88_p1 }
   0x5   : > { %s108_s8 = smul.u32 (!%p89_p2), 3, %s251_s7 }
   0x6   : > { %92 = sbr.rel (%p89_p2) target bundleno = 57 (0x39), region = 24 }
   0x7   : > { %p109_p3 = scmp.lt.s32.totalorder (!%p89_p2), %s108_s8, 5 }
   0xb   : > { %s341_s8 = smov (!%p109_p3, %s108_s8), 5 }
   0xc   : > { %s256_s9 = sshll.u32 %s341_s8, 3 }
   0xd   : > { %s112_s12 = scalar_lea.vmem %s338_s0, %s256_s9  ;;  %s118_s15 = scalar_lea.vmem %s339_s1, %s256_s9 }
   0xe   : > { %v314_v0 = vld [vmem:[%s112_s12] sm:$0xff]  ;;  %v316_v1 = vld [vmem:[%s112_s12 + $0x8] sm:$0xff]  ;;  %v318_v2 = vld [vmem:[%s112_s12 + $0x10] sm:$0xff] }
   0xf   : > { %v123_v3 = vmul.f32 %v314_v0, %v314_v0  ;;  %v124_v4 = vmul.f32 %v316_v1, %v316_v1  ;;  %v125_v5 = vmul.f32 %v318_v2, %v318_v2 }
  0x11   : > { %v126_v6 = vrot.slane %v123_v3, 4  ;;  %v132_v7 = vrot.slane %v124_v4, 4  ;;  %v138_v8 = vrot.slane %v125_v5, 4 }
  0x13   : > { %v127_v9 = vadd.f32 %v126_v6, %v123_v3  ;;  %v133_v10 = vadd.f32 %v132_v7, %v124_v4  ;;  %v139_v11 = vadd.f32 %v138_v8, %v125_v5 }
  0x15   : > { %v128_v12 = vrot.slane %v127_v9, 2  ;;  %v134_v13 = vrot.slane %v133_v10, 2  ;;  %v140_v14 = vrot.slane %v139_v11, 2 }
  0x17   : > { %v129_v15 = vadd.f32 %v128_v12, %v127_v9  ;;  %v135_v16 = vadd.f32 %v134_v13, %v133_v10  ;;  %v141_v17 = vadd.f32 %v140_v14, %v139_v11 }
  0x19   : > { %v130_v18 = vrot.slane %v129_v15, 1  ;;  %v136_v19 = vrot.slane %v135_v16, 1  ;;  %v142_v20 = vrot.slane %v141_v17, 1 }
  0x1b   : > { %v131_v21 = vadd.f32 %v130_v18, %v129_v15  ;;  %v137_v22 = vadd.f32 %v136_v19, %v135_v16  ;;  %v143_v23 = vadd.f32 %v142_v20, %v141_v17 }
  0x1d   : > { %268 = vrsqrt.f32 %v131_v21  ;;  %v180_v28 = vadd.f32 1.0, %v131_v21  ;;  %v181_v31 = vadd.f32 1.0, %v137_v22  ;;  %v182_v34 = vadd.f32 1.0, %v143_v23 }
  0x1e   : > { %270 = vrsqrt.f32 %v137_v22  ;;  %vm151_vm0 = vcmp.eq.f32.partialorder %v131_v21, inf  ;;  %vm153_vm1 = vcmp.eq.f32.partialorder %v131_v21, 0.0  ;;  %v154_v43 = vand.u32 2147483648, %v131_v21 }
  0x1f   : > { %272 = vrsqrt.f32 %v143_v23  ;;  %vm163_vm2 = vcmp.eq.f32.partialorder %v137_v22, inf  ;;  %v166_v46 = vand.u32 2147483648, %v137_v22  ;;  %vm165_vm3 = vcmp.eq.f32.partialorder %v137_v22, 0.0 }
  0x20   : > { %274 = vrcp.f32 %v180_v28  ;;  %vm175_vm4 = vcmp.eq.f32.partialorder %v143_v23, inf  ;;  %v178_v50 = vand.u32 2147483648, %v143_v23  ;;  %vm177_vm5 = vcmp.eq.f32.partialorder %v143_v23, 0.0 }
  0x21   : > { %276 = vrcp.f32 %v181_v31 }
  0x22   : > { %278 = vrcp.f32 %v182_v34 }
  0x23   : > { %v269_v24 = vpop.eup %268 }
  0x24   : > { %v271_v25 = vpop.eup %270  ;;  %v145_v26 = vmul.f32 %v269_v24, %v131_v21 }
  0x25   : > { %v273_v27 = vpop.eup %272  ;;  %v157_v29 = vmul.f32 %v271_v25, %v137_v22 }
  0x26   : > { %v146_v30 = vmul.f32 %v269_v24, %v145_v26  ;;  %v169_v32 = vmul.f32 %v273_v27, %v143_v23  ;;  %v275_v48 = vpop.eup %274 }
  0x27   : > { %v158_v33 = vmul.f32 %v271_v25, %v157_v29  ;;  %v277_v51 = vpop.eup %276 }
  0x28   : > { %v147_v35 = vmul.f32 0.5, %v146_v30  ;;  %v170_v36 = vmul.f32 %v273_v27, %v169_v32  ;;  %v279_v54 = vpop.eup %278 }
  0x29   : > { %v159_v37 = vmul.f32 0.5, %v158_v33 }
  0x2a   : > { %v148_v38 = vsub.f32 1.5, %v147_v35  ;;  %v171_v39 = vmul.f32 0.5, %v170_v36 }
  0x2b   : > { %v160_v40 = vsub.f32 1.5, %v159_v37 }
  0x2c   : > { %v149_v41 = vmul.f32 %v269_v24, %v148_v38  ;;  %v172_v42 = vsub.f32 1.5, %v171_v39 }
  0x2d   : > { %v161_v44 = vmul.f32 %v271_v25, %v160_v40 }
  0x2e   : > { %v150_v45 = vmul.f32 %v149_v41, %v131_v21  ;;  %v173_v47 = vmul.f32 %v273_v27, %v172_v42 }
  0x2f   : > { %v162_v49 = vmul.f32 %v161_v44, %v137_v22 }
  0x30   : > { %v152_v52 = vsel %vm151_vm0, %v131_v21, %v150_v45  ;;  %v174_v53 = vmul.f32 %v173_v47, %v143_v23 }
  0x31   : > { %v155_v55 = vsel %vm153_vm1, %v154_v43, %v152_v52  ;;  %v164_v56 = vsel %vm163_vm2, %v137_v22, %v162_v49 }
  0x32   : > { %v186_v57 = vmul.f32 %v275_v48, %v155_v55  ;;  %v167_v58 = vsel %vm165_vm3, %v166_v46, %v164_v56  ;;  %v176_v59 = vsel %vm175_vm4, %v143_v23, %v174_v53 }
  0x33   : > { %v187_v60 = vmul.f32 %v277_v51, %v167_v58  ;;  %v179_v61 = vsel %vm177_vm5, %v178_v50, %v176_v59 }
  0x34   : > { %v189_v62 = vmul.f32 %v186_v57, %v314_v0  ;;  %v188_v63 = vmul.f32 %v279_v54, %v179_v61 }
  0x35   : > { %v190_v3 = vmul.f32 %v187_v60, %v316_v1 }
  0x36   : > { %192 = vst [vmem:[%s118_s15] sm:$0xff] %v189_v62  ;;  %v191_v4 = vmul.f32 %v188_v63, %v318_v2 }
  0x37   : > { %193 = vst [vmem:[%s118_s15 + $0x8] sm:$0xff] %v190_v3 }
  0x38   : > { %194 = vst [vmem:[%s118_s15 + $0x10] sm:$0xff] %v191_v4 }
  0x39 PF: > { %s11_s6 = sadd.s32 1, %s286_s6  }
  0x3a   : > { %p8_p4 = scmp.ge.s32.totalorder %s11_s6, 4  }
  0x3c   :  { %10 = sbr.rel (!%p8_p4) target bundleno = 1 (0x1), region = 54 }

</bundles_post_ra>
